<compile_context>
chip_gen: v7x
topology: tpu7x:2x2x1
jax: 0.10.0
libtpu: 0.0.40
codegen_flags: <defaults>
</compile_context>

<pallas_src>
import functools

import jax
import jax.numpy as jnp
from jax.experimental import pallas as pl
from jax.experimental.pallas import tpu as pltpu

SEQ_LEN = 24
HIDDEN = 64
PRED_LEN = 24


def _round_up(x, m):
    return ((x + m - 1) // m) * m


def _mlp_kernel(x_ref, w1_ref, b1_ref, w2_ref, b2_ref, o_ref):
    # x_ref : (SEQ_LEN, TN)        w1_ref: (HIDDEN, SEQ_LEN)   b1_ref: (HIDDEN, 1)
    # w2_ref: (PRED_LEN, HIDDEN)   b2_ref: (PRED_LEN, 1)       o_ref : (PRED_LEN, TN)
    h = jnp.dot(w1_ref[...], x_ref[...], preferred_element_type=jnp.float32)
    h = jnp.maximum(h + b1_ref[...], 0.0)          # bias broadcast along lanes, ReLU
    y = jnp.dot(w2_ref[...], h, preferred_element_type=jnp.float32)
    o_ref[...] = (y + b2_ref[...]).astype(o_ref.dtype)


@functools.partial(jax.jit, static_argnames=("tn",))
def mlp_forward(history_data, w1, b1, w2, b2, *, tn=1024):
    """history_data: [B, L, N, 1]  ->  [B, PRED_LEN, N, 1].

    w1: (HIDDEN, SEQ_LEN), b1: (HIDDEN, 1), w2: (PRED_LEN, HIDDEN), b2: (PRED_LEN, 1)
    (PyTorch nn.Linear native (out, in) weight layout).
    """
    assert history_data.shape[-1] == 1
    B, L, N, _ = history_data.shape
    assert L == SEQ_LEN

    x = history_data[..., 0]                       # [B, L, N] — squeeze only, no transpose
    # Note: for a further ~2x on HBM-bound traffic, x / the output could be
    # narrowed to bfloat16 here (dots already accumulate in f32); kept f32 to
    # match the f32 PyTorch reference tolerance.

    # Lane-dense tile over the node dimension.  For N >= 128 the tile is a
    # multiple of 128 not exceeding N (so every block shape <= array dim and
    # only the final block is masked); for tiny N we take the full dimension.
    if N < 128:
        tile_n = N
    else:
        tile_n = min(_round_up(tn, 128), (N // 128) * 128)
    n_blocks = pl.cdiv(N, tile_n)
    grid = (B, n_blocks)

    itemsize = jnp.dtype(x.dtype).itemsize
    flops = 2 * B * N * (SEQ_LEN * HIDDEN + HIDDEN * PRED_LEN)
    bytes_accessed = (
        B * N * (SEQ_LEN + PRED_LEN) * itemsize
        + (w1.size + b1.size + w2.size + b2.size) * 4
    )

    out = pl.pallas_call(
        _mlp_kernel,
        out_shape=jax.ShapeDtypeStruct((B, PRED_LEN, N), x.dtype),
        grid_spec=pltpu.PrefetchScalarGridSpec(
            num_scalar_prefetch=0,
            grid=grid,
            in_specs=[
                # (None, ...) squeezes the batch dim; kernel sees (SEQ_LEN, tile_n).
                pl.BlockSpec((None, SEQ_LEN, tile_n), lambda b, j: (b, 0, j)),
                pl.BlockSpec((HIDDEN, SEQ_LEN), lambda b, j: (0, 0)),
                pl.BlockSpec((HIDDEN, 1), lambda b, j: (0, 0)),
                pl.BlockSpec((PRED_LEN, HIDDEN), lambda b, j: (0, 0)),
                pl.BlockSpec((PRED_LEN, 1), lambda b, j: (0, 0)),
            ],
            out_specs=pl.BlockSpec((None, PRED_LEN, tile_n), lambda b, j: (b, 0, j)),
        ),
        compiler_params=pltpu.CompilerParams(
            dimension_semantics=("parallel", "parallel"),
        ),
        cost_estimate=pl.CostEstimate(
            flops=flops, transcendentals=0, bytes_accessed=bytes_accessed
        ),
    )(x, w1, b1, w2, b2)

    return out[..., None]                          # [B, PRED_LEN, N, 1]


def init_params(key):
    """Deterministic init mimicking nn.Linear defaults (uniform ±1/sqrt(fan_in)),
    weights kept in PyTorch (out_features, in_features) layout."""
    k1, k2, k3, k4 = jax.random.split(key, 4)
    bound1 = 1.0 / jnp.sqrt(SEQ_LEN)
    bound2 = 1.0 / jnp.sqrt(HIDDEN)
    w1 = jax.random.uniform(k1, (HIDDEN, SEQ_LEN), jnp.float32, -bound1, bound1)
    b1 = jax.random.uniform(k2, (HIDDEN, 1), jnp.float32, -bound1, bound1)
    w2 = jax.random.uniform(k3, (PRED_LEN, HIDDEN), jnp.float32, -bound2, bound2)
    b2 = jax.random.uniform(k4, (PRED_LEN, 1), jnp.float32, -bound2, bound2)
    return w1, b1, w2, b2


def _reference(history_data, w1, b1, w2, b2):
    # Pure-JAX mirror of the PyTorch module:
    #   y = Linear2(relu(Linear1(x.permute(0,2,1)))).permute(0,2,1).unsqueeze(-1)
    x_ref = jnp.transpose(history_data[..., 0], (0, 2, 1))      # [B, N, L]
    h_ref = jnp.maximum(x_ref @ w1.T + b1[:, 0], 0.0)           # [B, N, H]
    y_ref = h_ref @ w2.T + b2[:, 0]                             # [B, N, P]
    return jnp.transpose(y_ref, (0, 2, 1))[..., None]           # [B, P, N, 1]


if __name__ == "__main__":
    key = jax.random.PRNGKey(0)
    k_in, k_in2, k_par = jax.random.split(key, 3)

    w1, b1, w2, b2 = init_params(k_par)

    # Small shape (N < 128 path).
    B, N = 2, 16
    history_data = jax.random.normal(k_in, (B, SEQ_LEN, N, 1), jnp.float32)
    out = jax.block_until_ready(mlp_forward(history_data, w1, b1, w2, b2))
    y_ref = _reference(history_data, w1, b1, w2, b2)
    assert out.shape == (B, PRED_LEN, N, 1)
    assert jnp.allclose(out, y_ref, atol=1e-5, rtol=1e-5)

    # Non-128-aligned node count (exercises the masked partial final block).
    B2, N2 = 2, 300
    history_data2 = jax.random.normal(k_in2, (B2, SEQ_LEN, N2, 1), jnp.float32)
    out2 = jax.block_until_ready(mlp_forward(history_data2, w1, b1, w2, b2))
    y_ref2 = _reference(history_data2, w1, b1, w2, b2)
    assert out2.shape == (B2, PRED_LEN, N2, 1)
    assert jnp.allclose(out2, y_ref2, atol=1e-5, rtol=1e-5)

    print("KERNEL_OK")
</pallas_src>

<mosaic_0001>
module attributes {stable_mosaic.version = 11 : i64} {
  func.func @_mlp_kernel(%arg0: i32, %arg1: i32, %arg2: memref<1x24x16xf32, #tpu.memory_space<vmem>>, %arg3: memref<64x24xf32, #tpu.memory_space<vmem>>, %arg4: memref<64x1xf32, #tpu.memory_space<vmem>>, %arg5: memref<24x64xf32, #tpu.memory_space<vmem>>, %arg6: memref<24x1xf32, #tpu.memory_space<vmem>>, %arg7: memref<1x24x16xf32, #tpu.memory_space<vmem>>) attributes {dimension_semantics = [#tpu.dimension_semantics<parallel>, #tpu.dimension_semantics<parallel>], iteration_bounds = array<i64: 2, 1>, scalar_prefetch = 0 : i64, scratch_operands = 0 : i64, tpu.core_type = #tpu.core_type<tc>, window_params = [{transform_indices = @transform_0, window_bounds = array<i64: 1, 24, 16>}, {pipeline_mode = #tpu.pipeline_mode<synchronous>, transform_indices = @transform_1, window_bounds = array<i64: 64, 24>}, {pipeline_mode = #tpu.pipeline_mode<synchronous>, transform_indices = @transform_2, window_bounds = array<i64: 64, 1>}, {pipeline_mode = #tpu.pipeline_mode<synchronous>, transform_indices = @transform_3, window_bounds = array<i64: 24, 64>}, {pipeline_mode = #tpu.pipeline_mode<synchronous>, transform_indices = @transform_4, window_bounds = array<i64: 24, 1>}, {transform_indices = @transform_5, window_bounds = array<i64: 1, 24, 16>}]} {
    %c0 = arith.constant 0 : index
    %c0_0 = arith.constant 0 : index
    %0 = vector.load %arg3[%c0, %c0_0] : memref<64x24xf32, #tpu.memory_space<vmem>>, vector<64x24xf32>
    %c0_1 = arith.constant 0 : index
    %c0_2 = arith.constant 0 : index
    %c0_3 = arith.constant 0 : index
    %1 = vector.load %arg2[%c0_1, %c0_2, %c0_3] : memref<1x24x16xf32, #tpu.memory_space<vmem>>, vector<1x24x16xf32>
    %2 = vector.shape_cast %1 : vector<1x24x16xf32> to vector<24x16xf32>
    %cst = arith.constant dense<0.000000e+00> : vector<64x16xf32>
    %3 = tpu.matmul %0, %2, %cst {dimension_numbers = #tpu.dot_dimension_numbers<[1], [0], [0], [1], [0, 0, 1, 1], [], []>} : vector<64x24xf32>, vector<24x16xf32>, vector<64x16xf32> -> vector<64x16xf32>
    %c0_4 = arith.constant 0 : index
    %c0_5 = arith.constant 0 : index
    %4 = vector.load %arg4[%c0_4, %c0_5] : memref<64x1xf32, #tpu.memory_space<vmem>>, vector<64x1xf32>
    %5 = vector.broadcast %4 : vector<64x1xf32> to vector<64x16xf32>
    %6 = arith.addf %3, %5 : vector<64x16xf32>
    %cst_6 = arith.constant 0.000000e+00 : f32
    %7 = vector.broadcast %cst_6 : f32 to vector<64x16xf32>
    %8 = arith.maximumf %6, %7 : vector<64x16xf32>
    %c0_7 = arith.constant 0 : index
    %c0_8 = arith.constant 0 : index
    %9 = vector.load %arg5[%c0_7, %c0_8] : memref<24x64xf32, #tpu.memory_space<vmem>>, vector<24x64xf32>
    %cst_9 = arith.constant dense<0.000000e+00> : vector<24x16xf32>
    %10 = tpu.matmul %9, %8, %cst_9 {dimension_numbers = #tpu.dot_dimension_numbers<[1], [0], [0], [1], [0, 0, 1, 1], [], []>} : vector<24x64xf32>, vector<64x16xf32>, vector<24x16xf32> -> vector<24x16xf32>
    %c0_10 = arith.constant 0 : index
    %c0_11 = arith.constant 0 : index
    %11 = vector.load %arg6[%c0_10, %c0_11] : memref<24x1xf32, #tpu.memory_space<vmem>>, vector<24x1xf32>
    %12 = vector.broadcast %11 : vector<24x1xf32> to vector<24x16xf32>
    %13 = arith.addf %10, %12 : vector<24x16xf32>
    %c0_12 = arith.constant 0 : index
    %c0_13 = arith.constant 0 : index
    %c0_14 = arith.constant 0 : index
    %14 = vector.load %arg7[%c0_12, %c0_13, %c0_14] : memref<1x24x16xf32, #tpu.memory_space<vmem>>, vector<1x24x16xf32>
    %15 = vector.shape_cast %14 : vector<1x24x16xf32> to vector<24x16xf32>
    %16 = vector.shape_cast %13 : vector<24x16xf32> to vector<1x24x16xf32>
    tpu.vector_store %arg7[%c0_12, %c0_13, %c0_14], %16 {strides = array<i32>} : memref<1x24x16xf32, #tpu.memory_space<vmem>>, vector<1x24x16xf32>,
    return
  }
  func.func @transform_0(%arg0: i32, %arg1: i32) -> (i32, i32, i32) {
    %c0_i32 = arith.constant 0 : i32
    %c0_i32_0 = arith.constant 0 : i32
    return %arg0, %c0_i32, %arg1 : i32, i32, i32
  }
  func.func @transform_1(%arg0: i32, %arg1: i32) -> (i32, i32) {
    %c0_i32 = arith.constant 0 : i32
    %c0_i32_0 = arith.constant 0 : i32
    %c0_i32_1 = arith.constant 0 : i32
    return %c0_i32, %c0_i32_0 : i32, i32
  }
  func.func @transform_2(%arg0: i32, %arg1: i32) -> (i32, i32) {
    %c0_i32 = arith.constant 0 : i32
    %c0_i32_0 = arith.constant 0 : i32
    %c0_i32_1 = arith.constant 0 : i32
    return %c0_i32, %c0_i32_0 : i32, i32
  }
  func.func @transform_3(%arg0: i32, %arg1: i32) -> (i32, i32) {
    %c0_i32 = arith.constant 0 : i32
    %c0_i32_0 = arith.constant 0 : i32
    %c0_i32_1 = arith.constant 0 : i32
    return %c0_i32, %c0_i32_0 : i32, i32
  }
  func.func @transform_4(%arg0: i32, %arg1: i32) -> (i32, i32) {
    %c0_i32 = arith.constant 0 : i32
    %c0_i32_0 = arith.constant 0 : i32
    %c0_i32_1 = arith.constant 0 : i32
    return %c0_i32, %c0_i32_0 : i32, i32
  }
  func.func @transform_5(%arg0: i32, %arg1: i32) -> (i32, i32, i32) {
    %c0_i32 = arith.constant 0 : i32
    %c0_i32_0 = arith.constant 0 : i32
    return %arg0, %c0_i32, %arg1 : i32, i32, i32
  }
}

</mosaic_0001>

<bundles_post_ra>
// kernel: mlp_forward.1
= control target key start
LH: loop header
LB: loop body
LE: loop exit
PB: predicated region body
PF: predicated region fallthrough
CT: control target
= control target key end

     0   :  { %s841_s18 = smov 0   ;;  %s843_s19 = smov 0   ;;  %s958_s0 = inlined_call_operand.vmem [shape: f32[2,24,16], index: 0, kind: input, shape index: {}]   ;;  %s959_s1 = inlined_call_operand.vmem [shape: f32[64,24], index: 1, kind: input, shape index: {}]   ;;  %s960_s2 = inlined_call_operand.vmem [shape: f32[64,1], index: 2, kind: input, shape index: {}]   ;;  %s961_s3 = inlined_call_operand.vmem [shape: f32[24,64], index: 3, kind: input, shape index: {}]   ;;  %s962_s4 = inlined_call_operand.vmem [shape: f32[24,1], index: 4, kind: input, shape index: {}]   ;;  %s963_s5 = inlined_call_operand.vmem [shape: f32[2,24,16], index: 5, kind: output, shape index: {}]  }
   0x1   :  { %s845_s20 = smov 0  }
   0x2 LB: > { %s27_s21 = sadd.s32 1, %s801_s19  ;;  %p655_p0 = scmp.ge.s32.totalorder %s805_s20, 1  ;;  %s805_s20 = sphi %s845_s20, %s15_s20   ;;  %s801_s19 = sphi %s843_s19, %s965_s19   ;;  %s797_s18 = sphi %s841_s18, %s964_s18  }
   0x3   : > { %p29_p1 = scmp.ge.s32.totalorder %s27_s21, 2  ;;  %p206_p2 = scmp.lt.s32.totalorder %s805_s20, 3 }
   0x5   : > { %s967_s21 = smov (%p29_p1, %s27_s21), 0  ;;  %p207_p3 = pnand %p655_p0, %p206_p2 }
   0x6   : > { %p240_p4 = scmp.lt.s32.totalorder (!%p207_p3), %s797_s18, 1  ;;  %v256_v0 = vld [vmem:[%s959_s1] sm:$0xff] (!%p207_p3)  ;;  %vm315_vm0 = vcmask (!%p207_p3), 195584   ;;  %v807_v1 = vmov (!%p207_p3), 0   ;;  %v269_v3 = vld [vmem:[%s960_s2 + $0x10] sm:$0xff] (!%p207_p3)  ;;  %v268_v4 = vld [vmem:[%s960_s2 + $0x8] sm:$0xff] (!%p207_p3) }
   0x7   : > { %210 = sbr.rel (%p207_p3) target bundleno = 484 (0x1e4), region = 40  ;;  %699 = vmatprep.mubr.msk.f32.mxu0 (!%p207_p3), %vm315_vm0, %v256_v0  ;;  %781 = vset.pattern.permute.xlu0 (!%p207_p3), %v807_v1  ;;  %v267_v2 = vld [vmem:[%s960_s2] sm:$0xff] (!%p207_p3)  ;;  %v270_v5 = vld [vmem:[%s960_s2 + $0x18] sm:$0xff] (!%p207_p3)  ;;  %v272_v11 = vld [vmem:[%s960_s2 + $0x28] sm:$0xff] (!%p207_p3)  ;;  %v808_v24 = vmov (!%p207_p3), 0.0|0.0   ;;  %vm809_vm1 = vmmov (!%p207_p3), 0  }
   0x8   : > { %782 = vset.pattern.permute.xlu1 (!%p207_p3), %v807_v1  ;;  %277 = vperm.xlu0 (!%p207_p3), %781, %v267_v2   ;;  %v271_v9 = vld [vmem:[%s960_s2 + $0x20] sm:$0xff] (!%p207_p3)  ;;  %v273_v12 = vld [vmem:[%s960_s2 + $0x30] sm:$0xff] (!%p207_p3)  ;;  %v257_v13 = vld [vmem:[%s959_s1 + $0x8] sm:$0xff] (!%p207_p3)  ;;  %v810_v25 = vmov (!%p207_p3), 0.0   ;;  %vm474_vm2 = vcmask (!%p207_p3), 523264   ;;  %vm564_vm3 = vcmask (!%p207_p3), 130048  }
   0x9   : > { %287 = vperm.xlu1 (!%p207_p3), %782, %v269_v3   ;;  %v274_v14 = vld [vmem:[%s960_s2 + $0x38] sm:$0xff] (!%p207_p3)  ;;  %v258_v15 = vld [vmem:[%s959_s1 + $0x10] sm:$0xff] (!%p207_p3)  ;;  %v456_v16 = vld [vmem:[%s962_s4] sm:$0xff] (!%p207_p3)  ;;  %740 = vmatprep.subr.bf16.mxu1 (!%p207_p3), %v808_v24 }
   0xa   : > { %v259_v17 = vld [vmem:[%s959_s1 + $0x18] sm:$0xff] (!%p207_p3)  ;;  %v457_v18 = vld [vmem:[%s962_s4 + $0x8] sm:$0xff] (!%p207_p3)  ;;  %v260_v19 = vld [vmem:[%s959_s1 + $0x20] sm:$0xff] (!%p207_p3)  ;;  %727 = vmatprep.mubr.msk.f32.mxu1 (!%p207_p3), %vm809_vm1, %v810_v25 }
   0xb   : > { %v458_v20 = vld [vmem:[%s962_s4 + $0x10] sm:$0xff] (!%p207_p3)  ;;  %v261_v21 = vld [vmem:[%s959_s1 + $0x28] sm:$0xff] (!%p207_p3)  ;;  %v263_v23 = vld [vmem:[%s959_s1 + $0x38] sm:$0xff] (!%p207_p3) }
   0xc   : > { %282 = vperm.xlu0 (!%p207_p3), %781, %v268_v4   ;;  %v262_v22 = vld [vmem:[%s959_s1 + $0x30] sm:$0xff] (!%p207_p3)  ;;  %v453_v62 = vld [vmem:[%s961_s3] sm:$0xff] (!%p207_p3)  ;;  %v454_v63 = vld [vmem:[%s961_s3 + $0x8] sm:$0xff] (!%p207_p3) }
   0xd   : > { %292 = vperm.xlu1 (!%p207_p3), %782, %v270_v5   ;;  %v455_v0 = vld [vmem:[%s961_s3 + $0x10] sm:$0xff] (!%p207_p3) }
   0xe   : > { %s969_s18 = smov (!%p240_p4, %s797_s18), 1 }
   0xf   : > { %s752_s28 = smul.u32 24, %s969_s18 }
  0x10   : > { %297 = vperm.xlu0 %781, %v271_v9  }
  0x11   : > { %s247_s10 = scalar_lea.vmem %s958_s0, %s752_s28  ;;  %302 = vperm.xlu1 %782, %v272_v11   ;;  %s255_s7 = scalar_lea.vmem %s963_s5, %s752_s28 }
  0x12   : > { %v264_v6 = vld [vmem:[%s247_s10] sm:$0xff]  ;;  %v265_v7 = vld [vmem:[%s247_s10 + $0x8] sm:$0xff]  ;;  %v266_v10 = vld [vmem:[%s247_s10 + $0x10] sm:$0xff] }
  0x13   : > { %v736_v8 = vpack.c.bf16 %v265_v7, %v264_v6 }
  0x14   : > { %307 = vperm.xlu0 %781, %v273_v12  }
  0x15   : > { %737 = vmatprep.subr.bf16.mxu0 %v736_v8  ;;  %312 = vperm.xlu1 %782, %v274_v14  }
  0x16   : > { %739 = vmatpush3.bf16.msra.mxu0 %v736_v8 }
  0x17   : > { %697 = vmatprep.subr.mxu0 %v266_v10 }
  0x18   : > { %461 = vperm.xlu0 %781, %v456_v16  }
  0x19   : > { %466 = vperm.xlu1 %782, %v457_v18  }
  0x1a   : > { %698 = vmatpush3.msra.mxu0 %v266_v10 }
  0x1b   : > { %700 = vmatmul.mubr.msk.f32.vlgmr.msra.gmra.mrb[0].mxu0 %vm315_vm0, %v257_v13 }
  0x1c   : > { %702 = vmatprep.mubr.msk.f32.mxu0 %vm315_vm0, %v258_v15  ;;  %471 = vperm.xlu0 %781, %v458_v20  }
  0x1f   : > { %703 = vmatmul.mubr.msk.f32.gmra.mrb[2].mxu0 %vm315_vm0, %v259_v17 }
  0x20   : > { %705 = vmatprep.mubr.msk.f32.mxu0 %vm315_vm0, %v260_v19 }
  0x23   : > { %706 = vmatmul.mubr.msk.f32.gmra.mrb[4].mxu0 %vm315_vm0, %v261_v21 }
  0x24   : > { %708 = vmatprep.mubr.msk.f32.mxu0 %vm315_vm0, %v262_v22 }
  0x27   : > { %709 = vmatmul.mubr.msk.f32.gmra.mrb[6].mxu0 %vm315_vm0, %v263_v23 }
  0x87   : > { %v278_v26 = vpop.permute.xlu0 %277 }
  0x88   : > { %v288_v27 = vpop.permute.xlu1 %287 }
  0x8b   : > { %v283_v28 = vpop.permute.xlu0 %282 }
  0x8c   : > { %v293_v29 = vpop.permute.xlu1 %292 }
  0x8f   : > { %v298_v42 = vpop.permute.xlu0 %297 }
  0x90   : > { %v303_v39 = vpop.permute.xlu1 %302 }
  0x93   : > { %v308_v54 = vpop.permute.xlu0 %307 }
  0x94   : > { %v313_v51 = vpop.permute.xlu1 %312 }
  0x97   : > { %v462_v1 = vpop.permute.xlu0 %461 }
  0x98   : > { %v467_v5 = vpop.permute.xlu1 %466 }
  0x9b   : > { %v472_v9 = vpop.permute.xlu0 %471 }
  0xee   : > { %v701_v30 = vpop.f32.mrb[0].mxu0 }
  0xef   : > { %v412_v31 = vadd.f32 %v701_v30, %v283_v28  ;;  %v406_v32 = vpop.f32.mrb[1].mxu0 }
  0xf0   : > { %v407_v33 = vadd.f32 %v406_v32, %v278_v26 }
  0xf1   : > { %v446_v34 = vmax.f32 %v412_v31, 0.0 }
  0xf2   : > { %v445_v35 = vmax.f32 %v407_v33, 0.0  ;;  %v704_v36 = vpop.f32.mrb[2].mxu0 }
  0xf3   : > { %v422_v37 = vadd.f32 %v704_v36, %v293_v29  ;;  %v416_v38 = vpop.f32.mrb[3].mxu0 }
  0xf4   : > { %v417_v40 = vadd.f32 %v416_v38, %v288_v27  ;;  %v741_v41 = vpack.c.bf16 %v446_v34, %v445_v35 }
  0xf5   : > { %v448_v43 = vmax.f32 %v422_v37, 0.0 }
  0xf6   : > { %v447_v44 = vmax.f32 %v417_v40, 0.0  ;;  %v707_v45 = vpop.f32.mrb[4].mxu0  ;;  %742 = vmatpush3.bf16.msra.mxu1 %v741_v41 }
  0xf7   : > { %v432_v46 = vadd.f32 %v707_v45, %v303_v39  ;;  %v426_v47 = vpop.f32.mrb[5].mxu0  ;;  %743 = vmatprep.subr.bf16.mxu1 %v808_v24 }
  0xf8   : > { %v744_v48 = vpack.c.bf16 %v448_v43, %v447_v44  ;;  %v427_v49 = vadd.f32 %v426_v47, %v298_v42 }
  0xf9   : > { %v450_v50 = vmax.f32 %v432_v46, 0.0 }
  0xfa   : > { %v449_v52 = vmax.f32 %v427_v49, 0.0  ;;  %v710_v53 = vpop.f32.mrb[6].mxu0  ;;  %745 = vmatpush3.bf16.msra.mxu1 %v744_v48 }
  0xfb   : > { %v442_v55 = vadd.f32 %v710_v53, %v313_v51  ;;  %v436_v56 = vpop.f32.mrb[7].mxu0  ;;  %746 = vmatprep.subr.bf16.mxu1 %v808_v24 }
  0xfc   : > { %v747_v57 = vpack.c.bf16 %v450_v50, %v449_v52  ;;  %v437_v58 = vadd.f32 %v436_v56, %v308_v54 }
  0xfd   : > { %v452_v59 = vmax.f32 %v442_v55, 0.0 }
  0xfe   : > { %v451_v60 = vmax.f32 %v437_v58, 0.0  ;;  %748 = vmatpush3.bf16.msra.mxu1 %v747_v57 }
  0xff   : > { %749 = vmatprep.subr.bf16.mxu1 %v808_v24 }
 0x100   : > { %v750_v61 = vpack.c.bf16 %v452_v59, %v451_v60 }
 0x102   : > { %751 = vmatpush3.bf16.msra.mxu1 %v750_v61 }
 0x105   : > { %728 = vmatmul.mubr.msk.f32.vlgmr.msra.gmra.mrb[0].mxu1 %vm474_vm2, %v453_v62 }
 0x106   : > { %730 = vmatprep.mubr.msk.f32.mxu1 %vm809_vm1, %v810_v25 }
 0x109   : > { %731 = vmatmul.mubr.msk.f32.gmra.mrb[2].mxu1 %vm474_vm2, %v454_v63 }
 0x10a   : > { %733 = vmatprep.mubr.msk.f32.mxu1 %vm809_vm1, %v810_v25 }
 0x10d   : > { %734 = vmatmul.mubr.msk.f32.gmra.mrb[4].mxu1 %vm474_vm2, %v455_v0 }
 0x1d8   : > { %v550_v2 = vpop.f32.mrb[0].mxu1 }
 0x1d9   : > { %v551_v3 = vadd.f32 %v550_v2, %v462_v1  ;;  %v729_v4 = vpop.f32.mrb[1].mxu1 }
 0x1db   : > { %565 = vst.msk [vmem:[%s255_s7] sm:$0xff] %vm564_vm3, %v551_v3 }
 0x1dc   : > { %v555_v6 = vpop.f32.mrb[2].mxu1 }
 0x1dd   : > { %v556_v7 = vadd.f32 %v555_v6, %v467_v5  ;;  %v732_v8 = vpop.f32.mrb[3].mxu1 }
 0x1df   : > { %566 = vst.msk [vmem:[%s255_s7 + $0x8] sm:$0xff] %vm564_vm3, %v556_v7 }
 0x1e0   : > { %v560_v10 = vpop.f32.mrb[4].mxu1 }
 0x1e1   : > { %v561_v11 = vadd.f32 %v560_v10, %v472_v9  ;;  %v735_v12 = vpop.f32.mrb[5].mxu1 }
 0x1e3   : > { %567 = vst.msk [vmem:[%s255_s7 + $0x10] sm:$0xff] %vm564_vm3, %v561_v11 }
 0x1e4 PF: > { %s15_s20 = sadd.s32 1, %s805_s20   ;;  %s964_s18 = smov %s801_s19 }
 0x1e5   : > { %p12_p5 = scmp.ge.s32.totalorder %s15_s20, 4   ;;  %s965_s19 = smov %s967_s21 }
 0x1e7   :  { %14 = sbr.rel (!%p12_p5) target bundleno = 2 (0x2), region = 70 }

</bundles_post_ra>
